<compile_context>
chip_gen: v6e
topology: v6e:2x2x1
jax: 0.10.0
libtpu: 0.0.40
codegen_flags: <defaults>
</compile_context>

<pallas_src>
import jax
import jax.numpy as jnp
from jax.experimental import pallas as pl
from jax.experimental.pallas import tpu as pltpu


def _ru(x, m):
    """Round x up to a multiple of m."""
    return ((x + m - 1) // m) * m


def _layout(F):
    """Sublane/lane-aligned layout of the packed parameter buffers."""
    d1, d2, d3 = 2 * F, 6 * F, 3 * F
    P1 = _ru(d1, 128)            # layer-1 output width, padded to full lanes
    P3 = _ru(d3, 128)            # layer-3 output width, padded to full lanes
    C = max(d2, P1, P3)          # pack width; layer-2 slices use the full width
    R2 = _ru(F, 8)               # first packed row of the W2 block
    R3 = R2 + P1                 # first packed row of the W3 block
    R4 = R3 + _ru(C, 8)          # packed row holding W4 (as a [1, 3F] row)
    R = _ru(R4 + 1, 8)           # total packed rows (sublane multiple)
    return d1, d2, d3, P1, P3, C, R2, R3, R4, R


def pack_params(params, feature_size):
    """Pack all 4 weights into one [R, C] buffer and all 4 biases into one
    [8, C] buffer, zero-padded so every in-kernel slice is lane/sublane clean.
    Call once; reuse the result across forward calls."""
    w1, b1, w2, b2, w3, b3, w4, b4 = params
    F = feature_size
    d1, d2, d3, P1, P3, C, R2, R3, R4, R = _layout(F)

    wp = jnp.zeros((R, C), jnp.float32)
    wp = wp.at[0:F, 0:d1].set(w1)               # W1: [F, 2F]
    wp = wp.at[R2:R2 + d1, 0:d2].set(w2)        # W2: [2F, 6F]
    wp = wp.at[R3:R3 + d2, 0:d3].set(w3)        # W3: [6F, 3F]
    wp = wp.at[R4:R4 + 1, 0:d3].set(w4.T)       # W4 stored as a row [1, 3F]

    bp = jnp.zeros((8, C), jnp.float32)         # 8 rows = one full sublane tile
    bp = bp.at[0, 0:d1].set(b1)
    bp = bp.at[1, 0:d2].set(b2)
    bp = bp.at[2, 0:d3].set(b3)
    bp = bp.at[3, 0].set(b4[0])
    return wp, bp


def make_value_model_kernel(feature_size):
    F = feature_size
    d1, d2, d3, P1, P3, C, R2, R3, R4, R = _layout(F)

    def kernel(x_ref, wp_ref, bp_ref, o_ref):
        x = x_ref[...]                                            # [TB, F]

        # Layer 1: tanh(x @ W1 + b1); width lane-padded to P1 (pad cols = 0).
        h = jnp.tanh(
            jnp.dot(x, wp_ref[0:F, 0:P1], preferred_element_type=jnp.float32)
            + bp_ref[0:1, 0:P1])

        # Layer 2: relu(h @ W2 + b2); full pack width C (pad rows/cols = 0).
        h = jnp.maximum(
            jnp.dot(h, wp_ref[R2:R2 + P1, 0:C],
                    preferred_element_type=jnp.float32)
            + bp_ref[1:2, 0:C], 0.0)

        # Layer 3: relu(h @ W3 + b3); width lane-padded to P3.
        h = jnp.maximum(
            jnp.dot(h, wp_ref[R3:R3 + C, 0:P3],
                    preferred_element_type=jnp.float32)
            + bp_ref[2:3, 0:P3], 0.0)

        # Output (3F -> 1): VPU multiply + lane reduce (no 1-wide MXU pass).
        w4 = wp_ref[R4:R4 + 1, 0:P3]                              # [1, P3]
        b4 = bp_ref[3:4, 0:1]                                     # [1, 1]
        y = jnp.sum(h * w4, axis=-1, keepdims=True) + b4          # [TB, 1]

        # Lane-dense store: broadcast the column across 128 lanes so the store
        # is an unmasked vst + dense writeback DMA (instead of a masked vst
        # plus a strided 4-bytes-per-row writeback). Wrapper keeps lane 0.
        o_ref[...] = jnp.broadcast_to(y, o_ref.shape)

    return kernel


def value_model_forward(features, packed_params, feature_size, row_block=128):
    """features: [T, B, F]; consumes features[0] exactly like the PyTorch module.

    The batch is processed in `row_block`-row blocks over a 1-D "parallel"
    grid: the packed weights/biases use a constant index_map, so they are
    DMA'd once per call and stay VMEM-resident for every row block; on v7x the
    two TensorCores split the row blocks.
    """
    wp, bp = packed_params
    T, B, F = features.shape
    assert F == feature_size

    TB = min(row_block, _ru(B, 8))           # rows per grid step (sublane mult.)
    B_pad = _ru(B, TB)
    num_blocks = B_pad // TB
    if B_pad != B:
        features = jnp.pad(features, ((0, 0), (0, B_pad - B), (0, 0)))

    kernel = make_value_model_kernel(F)

    out = pl.pallas_call(
        kernel,
        out_shape=jax.ShapeDtypeStruct((B_pad, 128), jnp.float32),
        grid=(num_blocks,),
        in_specs=[
            # features[0] selected via the squeezed leading block dim.
            pl.BlockSpec((None, TB, F), lambda i: (0, i, 0)),
            # Packed weights / biases: whole-array blocks with constant index
            # maps -> fetched once, resident across all row blocks.
            pl.BlockSpec(wp.shape, lambda i: (0, 0)),
            pl.BlockSpec(bp.shape, lambda i: (0, 0)),
        ],
        out_specs=pl.BlockSpec((TB, 128), lambda i: (i, 0)),
        compiler_params=pltpu.CompilerParams(
            dimension_semantics=("parallel",)),
    )(features, wp, bp)

    return out[:B, 0:1]                      # [B, 1], matching the PyTorch forward


def init_params(feature_size, key):
    """Deterministic init mimicking nn.Linear: U(-1/sqrt(fan_in), 1/sqrt(fan_in)).
    Weights stored [in, out] (transpose of PyTorch's [out, in]); math identical."""
    dims = [
        (feature_size, feature_size * 2),
        (feature_size * 2, feature_size * 6),
        (feature_size * 6, feature_size * 3),
        (feature_size * 3, 1),
    ]
    params = []
    for fan_in, fan_out in dims:
        key, kw, kb = jax.random.split(key, 3)
        bound = 1.0 / jnp.sqrt(float(fan_in))
        w = jax.random.uniform(kw, (fan_in, fan_out), jnp.float32, -bound, bound)
        b = jax.random.uniform(kb, (fan_out,), jnp.float32, -bound, bound)
        params += [w, b]
    return tuple(params)


def reference_forward(features, params):
    """Pure-JAX reference of the PyTorch forward (for correctness check)."""
    x = features[0]
    w1, b1, w2, b2, w3, b3, w4, b4 = params
    h = jnp.tanh(x @ w1 + b1)
    h = jax.nn.relu(h @ w2 + b2)
    h = jax.nn.relu(h @ w3 + b3)
    return h @ w4 + b4


if __name__ == "__main__":
    feature_size = 32
    batch = 200               # not a row_block multiple -> exercises padding + 2 grid steps
    num_feature_tensors = 2   # forward only consumes features[0]

    key = jax.random.PRNGKey(0)
    k_feat, k_params = jax.random.split(key)

    features = jax.random.normal(
        k_feat, (num_feature_tensors, batch, feature_size), jnp.float32)
    params = init_params(feature_size, k_params)
    packed = pack_params(params, feature_size)   # one-time; reused across calls

    out = value_model_forward(features, packed, feature_size)
    out = jax.block_until_ready(out)

    ref = reference_forward(features, params)
    assert out.shape == (batch, 1), out.shape
    err = jnp.max(jnp.abs(out - ref))
    assert jnp.allclose(out, ref, atol=3e-5, rtol=3e-5), (
        f"mismatch: max abs err {err}")

    print("KERNEL_OK")
</pallas_src>

<mosaic_0001>
module attributes {stable_mosaic.version = 11 : i64} {
  func.func @kernel(%arg0: i32, %arg1: memref<1x128x32xf32, #tpu.memory_space<vmem>>, %arg2: memref<360x192xf32, #tpu.memory_space<vmem>>, %arg3: memref<8x192xf32, #tpu.memory_space<vmem>>, %arg4: memref<128x128xf32, #tpu.memory_space<vmem>>) attributes {dimension_semantics = [#tpu.dimension_semantics<parallel>], iteration_bounds = array<i64: 2>, scalar_prefetch = 0 : i64, scratch_operands = 0 : i64, tpu.core_type = #tpu.core_type<tc>, window_params = [{transform_indices = @transform_0, window_bounds = array<i64: 1, 128, 32>}, {pipeline_mode = #tpu.pipeline_mode<synchronous>, transform_indices = @transform_1, window_bounds = array<i64: 360, 192>}, {pipeline_mode = #tpu.pipeline_mode<synchronous>, transform_indices = @transform_2, window_bounds = array<i64: 8, 192>}, {transform_indices = @transform_3, window_bounds = array<i64: 128, 128>}]} {
    %c0 = arith.constant 0 : index
    %c0_0 = arith.constant 0 : index
    %c0_1 = arith.constant 0 : index
    %0 = vector.load %arg1[%c0, %c0_0, %c0_1] : memref<1x128x32xf32, #tpu.memory_space<vmem>>, vector<1x128x32xf32>
    %1 = vector.shape_cast %0 : vector<1x128x32xf32> to vector<128x32xf32>
    %c0_2 = arith.constant 0 : index
    %c0_3 = arith.constant 0 : index
    %2 = vector.load %arg2[%c0_2, %c0_3] : memref<360x192xf32, #tpu.memory_space<vmem>>, vector<32x128xf32>
    %cst = arith.constant dense<0.000000e+00> : vector<128x128xf32>
    %3 = tpu.matmul %1, %2, %cst {dimension_numbers = #tpu.dot_dimension_numbers<[1], [0], [0], [1], [0, 0, 1, 1], [], []>} : vector<128x32xf32>, vector<32x128xf32>, vector<128x128xf32> -> vector<128x128xf32>
    %c0_4 = arith.constant 0 : index
    %c0_5 = arith.constant 0 : index
    %4 = vector.load %arg3[%c0_4, %c0_5] : memref<8x192xf32, #tpu.memory_space<vmem>>, vector<1x128xf32>
    %5 = vector.broadcast %4 : vector<1x128xf32> to vector<128x128xf32>
    %6 = arith.addf %3, %5 : vector<128x128xf32>
    %7 = math.tanh %6 : vector<128x128xf32>
    %c32 = arith.constant 32 : index
    %c0_6 = arith.constant 0 : index
    %8 = vector.load %arg2[%c32, %c0_6] : memref<360x192xf32, #tpu.memory_space<vmem>>, vector<128x192xf32>
    %cst_7 = arith.constant dense<0.000000e+00> : vector<128x192xf32>
    %9 = tpu.matmul %7, %8, %cst_7 {dimension_numbers = #tpu.dot_dimension_numbers<[1], [0], [0], [1], [0, 0, 1, 1], [], []>} : vector<128x128xf32>, vector<128x192xf32>, vector<128x192xf32> -> vector<128x192xf32>
    %c1 = arith.constant 1 : index
    %c0_8 = arith.constant 0 : index
    %10 = vector.load %arg3[%c1, %c0_8] : memref<8x192xf32, #tpu.memory_space<vmem>>, vector<1x192xf32>
    %11 = vector.broadcast %10 : vector<1x192xf32> to vector<128x192xf32>
    %12 = arith.addf %9, %11 : vector<128x192xf32>
    %cst_9 = arith.constant 0.000000e+00 : f32
    %13 = vector.broadcast %cst_9 : f32 to vector<128x192xf32>
    %14 = arith.maximumf %12, %13 : vector<128x192xf32>
    %c160 = arith.constant 160 : index
    %c0_10 = arith.constant 0 : index
    %15 = vector.load %arg2[%c160, %c0_10] : memref<360x192xf32, #tpu.memory_space<vmem>>, vector<192x128xf32>
    %cst_11 = arith.constant dense<0.000000e+00> : vector<128x128xf32>
    %16 = tpu.matmul %14, %15, %cst_11 {dimension_numbers = #tpu.dot_dimension_numbers<[1], [0], [0], [1], [0, 0, 1, 1], [], []>} : vector<128x192xf32>, vector<192x128xf32>, vector<128x128xf32> -> vector<128x128xf32>
    %c2 = arith.constant 2 : index
    %c0_12 = arith.constant 0 : index
    %17 = vector.load %arg3[%c2, %c0_12] : memref<8x192xf32, #tpu.memory_space<vmem>>, vector<1x128xf32>
    %18 = vector.broadcast %17 : vector<1x128xf32> to vector<128x128xf32>
    %19 = arith.addf %16, %18 : vector<128x128xf32>
    %cst_13 = arith.constant 0.000000e+00 : f32
    %20 = vector.broadcast %cst_13 : f32 to vector<128x128xf32>
    %21 = arith.maximumf %19, %20 : vector<128x128xf32>
    %c352 = arith.constant 352 : index
    %c0_14 = arith.constant 0 : index
    %22 = vector.load %arg2[%c352, %c0_14] : memref<360x192xf32, #tpu.memory_space<vmem>>, vector<1x128xf32>
    %c3 = arith.constant 3 : index
    %c0_15 = arith.constant 0 : index
    %23 = vector.load %arg3[%c3, %c0_15] : memref<8x192xf32, #tpu.memory_space<vmem>>, vector<1x1xf32>
    %24 = vector.broadcast %22 : vector<1x128xf32> to vector<128x128xf32>
    %25 = arith.mulf %21, %24 : vector<128x128xf32>
    %cst_16 = arith.constant dense<0.000000e+00> : vector<128xf32>
    %26 = vector.multi_reduction <add>, %25, %cst_16 [1] : vector<128x128xf32> to vector<128xf32>
    %27 = vector.shape_cast %26 : vector<128xf32> to vector<128x1xf32>
    %28 = vector.broadcast %23 : vector<1x1xf32> to vector<128x1xf32>
    %29 = arith.addf %27, %28 : vector<128x1xf32>
    %30 = vector.shape_cast %29 : vector<128x1xf32> to vector<128x1xf32>
    %31 = vector.broadcast %30 : vector<128x1xf32> to vector<128x128xf32>
    %c0_17 = arith.constant 0 : index
    %c0_18 = arith.constant 0 : index
    %32 = vector.load %arg4[%c0_17, %c0_18] : memref<128x128xf32, #tpu.memory_space<vmem>>, vector<128x128xf32>
    tpu.vector_store %arg4[%c0_17, %c0_18], %31 {strides = array<i32>} : memref<128x128xf32, #tpu.memory_space<vmem>>, vector<128x128xf32>,
    return
  }
  func.func @transform_0(%arg0: i32) -> (i32, i32, i32) {
    %c0_i32 = arith.constant 0 : i32
    %c0_i32_0 = arith.constant 0 : i32
    %c0_i32_1 = arith.constant 0 : i32
    return %c0_i32, %arg0, %c0_i32_0 : i32, i32, i32
  }
  func.func @transform_1(%arg0: i32) -> (i32, i32) {
    %c0_i32 = arith.constant 0 : i32
    %c0_i32_0 = arith.constant 0 : i32
    %c0_i32_1 = arith.constant 0 : i32
    return %c0_i32, %c0_i32_0 : i32, i32
  }
  func.func @transform_2(%arg0: i32) -> (i32, i32) {
    %c0_i32 = arith.constant 0 : i32
    %c0_i32_0 = arith.constant 0 : i32
    %c0_i32_1 = arith.constant 0 : i32
    return %c0_i32, %c0_i32_0 : i32, i32
  }
  func.func @transform_3(%arg0: i32) -> (i32, i32) {
    %c0_i32 = arith.constant 0 : i32
    %c0_i32_0 = arith.constant 0 : i32
    return %arg0, %c0_i32 : i32, i32
  }
}

</mosaic_0001>

<bundles_post_ra>
// kernel: tpu_custom_call.1
= control target key start
LH: loop header
LB: loop body
LE: loop exit
PB: predicated region body
PF: predicated region fallthrough
CT: control target
= control target key end

     0   :  { %8 = vsyncpa [#allocation3], 0  ;;  %s2027_s0 = inlined_call_operand.vmem [shape: f32[2,256,32], index: 0, kind: input, shape index: {}]   ;;  %s2028_s1 = inlined_call_operand.vmem [shape: f32[360,192], index: 1, kind: input, shape index: {}]   ;;  %s2029_s2 = inlined_call_operand.vmem [shape: f32[8,192], index: 2, kind: input, shape index: {}]   ;;  %s2030_s3 = inlined_call_operand.hbm [shape: f32[256,128], index: 3, kind: output, shape index: {}]  }
   0x1   :  { %10 = vsyncpa [#allocation3 + $0x1], 0  ;;  %s1424_s12 = smov 0   ;;  %s1426_s13 = smov 0  }
   0x2   :  { %s1428_s14 = smov 0   ;;  %s1430_s15 = smov 0  }
   0x3 LB: > { %s1445_s16 = sadd.s32 4294967295, %s1397_s15   ;;  %s1114_s17 = sadd.s32 4294967294, %s1397_s15   ;;  %s1397_s15 = sphi %s1430_s15, %s2036_s15   ;;  %s1393_s14 = sphi %s1428_s14, %s2035_s14   ;;  %s1389_s13 = sphi %s1426_s13, %s2034_s13   ;;  %s1385_s12 = sphi %s1424_s12, %s2033_s12  }
   0x4   : > { %s1449_s18 = sadd.s32 1, %s1397_s15   ;;  %s91_s19 = sadd.s32 1, %s1393_s14 }
   0x5   : > { %s88_s20 = ssub.s32 %s1397_s15, %s1449_s18  ;;  %p101_p0 = scmp.ne.s32.totalorder %s1393_s14, %s1389_s13 }
   0x6   : > { %p89_p1 = scmp.eq.s32.totalorder %s88_s20, 0  ;;  %p102_p2 = scmp.eq.s32.totalorder %s1445_s16, 1 }
   0x7   : > { %p107_p3 = scmp.ne.s32.totalorder %s1389_s13, %s1385_s12  ;;  %p108_p4 = scmp.eq.s32.totalorder %s1114_s17, 1 }
   0x8   : > { %s1460_s21 = scalar_select %p89_p1, %s1393_s14, %s91_s19  }
   0x9   : > { %p1462_p5 = por %p102_p2, %p101_p0  ;;  %p1466_p6 = por %p108_p4, %p107_p3 }
   0xa   : > { %p1117_p7 = scmp.ge.s32.totalorder %s1397_s15, 1  ;;  %p141_p8 = scmp.lt.s32.totalorder %s1397_s15, 3 }
   0xc   : > { %p142_p9 = pnand %p1117_p7, %p141_p8 }
   0xd   : > { %s1119_s28 = sshll.u32 (!%p142_p9), %s1445_s16, 4  ;;  %s162_s8 = sand.u32 (!%p142_p9), 1, %s1389_s13  }
   0xe   : > { %145 = sbr.rel (%p142_p9) target bundleno = 976 (0x3d0), region = 32  ;;  %p166_p10 = scmp.lt.s32.totalorder (!%p142_p9), %s1119_s28, 31 }
   0xf   : > { %s1159_s9 = sshll.u32 (!%p142_p9), %s1445_s16, 11  ;;  %s1987_s20 = scalar_lea.sflag (!%p142_p9), [#allocation3], %s162_s8 }
  0x10   : > { %s1980_s19 = scalar_lea.hbm (!%p142_p9), %s2030_s3, %s1159_s9  ;;  %s1401_s16 = smov (!%p142_p9), [#allocation2]  }
  0x11   : > { %s1341_s25 = sshll.u32 (!%p142_p9), %s1401_s16, 4  ;;  %s1342_s25 = int_to_ptr.vmem [resolvable:$false] %s1341_s25 }
  0x12   : > { %s1343_s26 = scalar_lea.vmem (!%p142_p9), %s1342_s25, 4096 }
  0x13   : > { %v191_v0 = vld [vmem:[%s2028_s1 + $0x30] sm:$0xff]  ;;  %v190_v1 = vld [vmem:[%s2028_s1 + $0x20] sm:$0xff]  ;;  %v434_v2 = vld [vmem:[%s2028_s1 + $0x138] sm:$0xff]  ;;  %s2038_s28 = smov (!%p166_p10, %s1119_s28), 31  ;;  %vm193_vm0 = vcmask 261120   ;;  %v1399_v51 = vmov 0.0  }
  0x14   : > { %1180 = vmatprep.subr.mxu0 %v191_v0  ;;  %v433_v3 = vld [vmem:[%s2028_s1 + $0x130] sm:$0xff]  ;;  %448 = vmatprep.subr.mxu1 %v434_v2  ;;  %v432_v5 = vld [vmem:[%s2028_s1 + $0x128] sm:$0xff]  ;;  %v431_v6 = vld [vmem:[%s2028_s1 + $0x120] sm:$0xff]  ;;  %s1120_s27 = sshll.u32 %s2038_s28, 3  ;;  %vm666_vm1 = vcmask 523264   ;;  %s1118_s28 = sshll.u32 %s162_s8, 7 }
  0x15   : > { %1181 = vmatpush3.msra.mxu0 %v191_v0  ;;  %v189_v4 = vld [vmem:[%s2028_s1 + $0x10] sm:$0xff]  ;;  %449 = vmatpush1.msra.mxu1 %v433_v3  ;;  %v430_v7 = vld [vmem:[%s2028_s1 + $0x118] sm:$0xff]  ;;  %v188_v8 = vld [vmem:[%s2028_s1] sm:$0xff]  ;;  %s1506_s4 = scalar_lea.vmem %s2027_s0, %s1120_s27 }
  0x16   : > { %1182 = vmatprep.subr.mxu0 %v190_v1  ;;  %450 = vmatprep.subr.mxu1 %v432_v5  ;;  %v429_v9 = vld [vmem:[%s2028_s1 + $0x110] sm:$0xff]  ;;  %v428_v10 = vld [vmem:[%s2028_s1 + $0x108] sm:$0xff]  ;;  %v427_v11 = vld [vmem:[%s2028_s1 + $0x100] sm:$0xff] }
  0x17   : > { %1183 = vmatpush3.msra.mxu0 %v190_v1  ;;  %451 = vmatpush1.msra.mxu1 %v431_v6  ;;  %v172_v12 = vld [vmem:[%s1506_s4] sm:$0xff]  ;;  %v173_v13 = vld [vmem:[%s1506_s4 + $0x8] sm:$0xff]  ;;  %v174_v14 = vld [vmem:[%s1506_s4 + $0x10] sm:$0xff] }
  0x18   : > { %1184 = vmatprep.subr.mxu0 %v189_v4  ;;  %452 = vmatprep.subr.mxu1 %v430_v7  ;;  %v426_v15 = vld [vmem:[%s2028_s1 + $0xf8] sm:$0xff]  ;;  %v425_v16 = vld [vmem:[%s2028_s1 + $0xf0] sm:$0xff]  ;;  %v424_v18 = vld [vmem:[%s2028_s1 + $0xe8] sm:$0xff] }
  0x19   : > { %1185 = vmatpush3.msra.mxu0 %v189_v4  ;;  %453 = vmatpush1.msra.mxu1 %v429_v9  ;;  %v175_v17 = vld [vmem:[%s1506_s4 + $0x18] sm:$0xff]  ;;  %v176_v19 = vld [vmem:[%s1506_s4 + $0x20] sm:$0xff]  ;;  %v177_v22 = vld [vmem:[%s1506_s4 + $0x28] sm:$0xff] }
  0x1a   : > { %1186 = vmatprep.subr.mxu0 %v188_v8  ;;  %1188 = vmatprep.mubr.msk.f32.mxu0 %vm193_vm0, %v172_v12  ;;  %v423_v20 = vld [vmem:[%s2028_s1 + $0xe0] sm:$0xff]  ;;  %v422_v21 = vld [vmem:[%s2028_s1 + $0xd8] sm:$0xff]  ;;  %v178_v23 = vld [vmem:[%s1506_s4 + $0x30] sm:$0xff] }
  0x1b   : > { %1187 = vmatpush3.msra.mxu0 %v188_v8  ;;  %454 = vmatprep.subr.mxu1 %v428_v10  ;;  %v179_v24 = vld [vmem:[%s1506_s4 + $0x38] sm:$0xff]  ;;  %v180_v25 = vld [vmem:[%s1506_s4 + $0x40] sm:$0xff]  ;;  %v181_v26 = vld [vmem:[%s1506_s4 + $0x48] sm:$0xff] }
  0x1c   : > { %1189 = vmatmul.mubr.msk.f32.vlgmr.msra.gmra.mxu0 %vm193_vm0, %v173_v13  ;;  %455 = vmatpush1.msra.mxu1 %v427_v11  ;;  %v182_v27 = vld [vmem:[%s1506_s4 + $0x50] sm:$0xff]  ;;  %v183_v28 = vld [vmem:[%s1506_s4 + $0x58] sm:$0xff]  ;;  %v184_v29 = vld [vmem:[%s1506_s4 + $0x60] sm:$0xff] }
  0x1d   : > { %1191 = vmatprep.mubr.msk.f32.mxu0 %vm193_vm0, %v174_v14  ;;  %456 = vmatprep.subr.mxu1 %v426_v15  ;;  %v185_v30 = vld [vmem:[%s1506_s4 + $0x68] sm:$0xff]  ;;  %v186_v31 = vld [vmem:[%s1506_s4 + $0x70] sm:$0xff]  ;;  %v187_v32 = vld [vmem:[%s1506_s4 + $0x78] sm:$0xff]  ;;  %s1958_s4 = scalar_lea.vmem [#allocation2], %s1118_s28 }
  0x1e   : > { %457 = vmatpush1.msra.mxu1 %v425_v16  ;;  %v421_v33 = vld [vmem:[%s2028_s1 + $0xd0] sm:$0xff]  ;;  %v420_v34 = vld [vmem:[%s2028_s1 + $0xc8] sm:$0xff]  ;;  %v419_v35 = vld [vmem:[%s2028_s1 + $0xc0] sm:$0xff]  ;;  %512 = vmatprep.mubr.f32.mxu1 %v1399_v51  ;;  %s1052_s10 = sshll.u32 %s1958_s4, 4  ;;  %s1982_s10 = int_to_ptr.vmem [resolvable:$true] %s1052_s10 }
  0x1f   : > { %458 = vmatprep.subr.mxu1 %v424_v18  ;;  %v418_v36 = vld [vmem:[%s2028_s1 + $0xb8] sm:$0xff]  ;;  %v417_v37 = vld [vmem:[%s2028_s1 + $0xb0] sm:$0xff]  ;;  %v416_v38 = vld [vmem:[%s2028_s1 + $0xa8] sm:$0xff]  ;;  %715 = vmatprep.subr.mxu0 %v1399_v51  ;;  %s1337_s24 = scalar_lea.vmem %s1982_s10, 2048  ;;  %p1344_p0 = scmp.lt.s32.totalorder %s1982_s10, %s1342_s25 }
  0x20   : > { %1192 = vmatmul.mubr.msk.f32.gmra.mxu0 %vm193_vm0, %v175_v17  ;;  %459 = vmatpush1.msra.mxu1 %v423_v20  ;;  %v415_v39 = vld [vmem:[%s2028_s1 + $0xa0] sm:$0xff]  ;;  %v414_v40 = vld [vmem:[%s2028_s1 + $0x98] sm:$0xff]  ;;  %v413_v41 = vld [vmem:[%s2028_s1 + $0x90] sm:$0xff]  ;;  %p1338_p11 = scmp.ne.s32.totalorder %s1982_s10, %s1337_s24  ;;  %p1345_p1 = scmp.lt.s32.totalorder %s1343_s26, %s1337_s24 }
  0x21   : > { %1194 = vmatprep.mubr.msk.f32.mxu0 %vm193_vm0, %v176_v19  ;;  %460 = vmatprep.subr.mxu1 %v422_v21  ;;  %v412_v42 = vld [vmem:[%s2028_s1 + $0x88] sm:$0xff]  ;;  %v411_v43 = vld [vmem:[%s2028_s1 + $0x80] sm:$0xff]  ;;  %v410_v44 = vld [vmem:[%s2028_s1 + $0x78] sm:$0xff] }
  0x22   : > { %461 = vmatpush1.msra.mxu1 %v421_v33  ;;  %v409_v45 = vld [vmem:[%s2028_s1 + $0x70] sm:$0xff]  ;;  %v408_v46 = vld [vmem:[%s2028_s1 + $0x68] sm:$0xff]  ;;  %v407_v47 = vld [vmem:[%s2028_s1 + $0x60] sm:$0xff]  ;;  %p1339_p12 = pnand %p1338_p11, %p1462_p5  ;;  %p1346_p2 = por %p1345_p1, %p1344_p0 }
  0x23   : > { %462 = vmatprep.subr.mxu1 %v420_v34  ;;  %v406_v48 = vld [vmem:[%s2028_s1 + $0x58] sm:$0xff]  ;;  %v405_v49 = vld [vmem:[%s2028_s1 + $0x50] sm:$0xff]  ;;  %v404_v50 = vld [vmem:[%s2028_s1 + $0x48] sm:$0xff] }
  0x24   : > { %1195 = vmatmul.mubr.msk.f32.gmra.mxu0 %vm193_vm0, %v177_v22  ;;  %463 = vmatpush1.msra.mxu1 %v419_v35  ;;  %v403_v52 = vld [vmem:[%s2028_s1 + $0x40] sm:$0xff]  ;;  %v1624_v53 = vld [vmem:[%s2028_s1 + $0x230] sm:$0xff]  ;;  %p1340_p13 = pneg %p1339_p12 }
  0x25   : > { %1197 = vmatprep.mubr.msk.f32.mxu0 %vm193_vm0, %v178_v23  ;;  %464 = vmatprep.subr.mxu1 %v418_v36  ;;  %v1629_v54 = vld [vmem:[%s2028_s1 + $0x220] sm:$0xff]  ;;  %v1636_v55 = vld [vmem:[%s2028_s1 + $0x210] sm:$0xff] }
  0x26   : > { %465 = vmatpush1.msra.mxu1 %v417_v37  ;;  %716 = vmatpush1.msra.mxu0 %v1624_v53  ;;  %v1643_v56 = vld [vmem:[%s2028_s1 + $0x200] sm:$0xff]  ;;  %v1650_v57 = vld [vmem:[%s2028_s1 + $0x1f0] sm:$0xff]  ;;  %p1347_p3 = pnand %p1346_p2, %p1340_p13 }
  0x27   : > { %466 = vmatprep.subr.mxu1 %v416_v38  ;;  %717 = vmatprep.subr.mxu0 %v1399_v51  ;;  %v1657_v58 = vld [vmem:[%s2028_s1 + $0x1e0] sm:$0xff]  ;;  %v1664_v59 = vld [vmem:[%s2028_s1 + $0x1d0] sm:$0xff] }
  0x28   : > { %1198 = vmatmul.mubr.msk.f32.gmra.mxu0 %vm193_vm0, %v179_v24  ;;  %467 = vmatpush1.msra.mxu1 %v415_v39  ;;  %v1671_v60 = vld [vmem:[%s2028_s1 + $0x1c0] sm:$0xff]  ;;  %v1678_v61 = vld [vmem:[%s2028_s1 + $0x1b0] sm:$0xff] }
  0x29   : > { %1200 = vmatprep.mubr.msk.f32.mxu0 %vm193_vm0, %v180_v25  ;;  %468 = vmatprep.subr.mxu1 %v414_v40  ;;  %v1685_v62 = vld [vmem:[%s2028_s1 + $0x1a0] sm:$0xff]  ;;  %v1692_v63 = vld [vmem:[%s2028_s1 + $0x190] sm:$0xff] }
  0x2a   : > { %469 = vmatpush1.msra.mxu1 %v413_v41  ;;  %718 = vmatpush1.msra.mxu0 %v1629_v54  ;;  %v1699_v0 = vld [vmem:[%s2028_s1 + $0x180] sm:$0xff]  ;;  %v1706_v1 = vld [vmem:[%s2028_s1 + $0x170] sm:$0xff] }
  0x2b   : > { %470 = vmatprep.subr.mxu1 %v412_v42  ;;  %719 = vmatprep.subr.mxu0 %v1399_v51  ;;  %v1713_v2 = vld [vmem:[%s2028_s1 + $0x160] sm:$0xff]  ;;  %v1720_v3 = vld [vmem:[%s2028_s1 + $0x150] sm:$0xff] }
  0x2c   : > { %1201 = vmatmul.mubr.msk.f32.gmra.mxu0 %vm193_vm0, %v181_v26  ;;  %471 = vmatpush1.msra.mxu1 %v411_v43  ;;  %v1727_v4 = vld [vmem:[%s2028_s1 + $0x140] sm:$0xff]  ;;  %v1734_v5 = vld [vmem:[%s2028_s1 + $0x2b0] sm:$0xff] }
  0x2d   : > { %1203 = vmatprep.mubr.msk.f32.mxu0 %vm193_vm0, %v182_v27  ;;  %472 = vmatprep.subr.mxu1 %v410_v44  ;;  %v1741_v6 = vld [vmem:[%s2028_s1 + $0x2a0] sm:$0xff]  ;;  %v1748_v7 = vld [vmem:[%s2028_s1 + $0x290] sm:$0xff] }
  0x2e   : > { %473 = vmatpush1.msra.mxu1 %v409_v45  ;;  %720 = vmatpush1.msra.mxu0 %v1636_v55  ;;  %v1755_v8 = vld [vmem:[%s2028_s1 + $0x280] sm:$0xff] }
  0x2f   : > { %474 = vmatprep.subr.mxu1 %v408_v46  ;;  %721 = vmatprep.subr.mxu0 %v1399_v51  ;;  %v1764_v10 = vld [vmem:[%s2029_s2] ss:$0 sm:$0xff] }
  0x30   : > { %1204 = vmatmul.mubr.msk.f32.gmra.mxu0 %vm193_vm0, %v183_v28  ;;  %475 = vmatpush1.msra.mxu1 %v407_v47 }
  0x31   : > { %1206 = vmatprep.mubr.msk.f32.mxu0 %vm193_vm0, %v184_v29  ;;  %476 = vmatprep.subr.mxu1 %v406_v48 }
  0x32   : > { %477 = vmatpush1.msra.mxu1 %v405_v49  ;;  %722 = vmatpush1.msra.mxu0 %v1643_v56 }
  0x33   : > { %478 = vmatprep.subr.mxu1 %v404_v50  ;;  %723 = vmatprep.subr.mxu0 %v1399_v51 }
  0x34   : > { %1207 = vmatmul.mubr.msk.f32.gmra.mxu0 %vm193_vm0, %v185_v30  ;;  %479 = vmatpush1.msra.mxu1 %v403_v52 }
  0x35   : > { %1209 = vmatprep.mubr.msk.f32.mxu0 %vm193_vm0, %v186_v31  ;;  %1212 = vmatprep.subr.mxu1 %v1399_v51 }
  0x36   : > { %724 = vmatpush1.msra.mxu0 %v1650_v57 }
  0x37   : > { %725 = vmatprep.subr.mxu0 %v1399_v51 }
  0x38   : > { %1210 = vmatmul.mubr.msk.f32.gmra.mxu0 %vm193_vm0, %v187_v32 }
  0x39   : > { %726 = vmatpush1.msra.mxu0 %v1657_v58 }
  0x3a   : > { %727 = vmatprep.subr.mxu0 %v1399_v51 }
  0x3b   : > { %728 = vmatpush1.msra.mxu0 %v1664_v59 }
  0x3c   : > { %729 = vmatprep.subr.mxu0 %v1399_v51 }
  0x3d   : > { %730 = vmatpush1.msra.mxu0 %v1671_v60 }
  0x3e   : > { %731 = vmatprep.subr.mxu0 %v1399_v51 }
  0x3f   : > { %732 = vmatpush1.msra.mxu0 %v1678_v61 }
  0x40   : > { %733 = vmatprep.subr.mxu0 %v1399_v51 }
  0x41   : > { %734 = vmatpush1.msra.mxu0 %v1685_v62 }
  0x42   : > { %735 = vmatprep.subr.mxu0 %v1399_v51 }
  0x43   : > { %736 = vmatpush1.msra.mxu0 %v1692_v63 }
  0x44   : > { %737 = vmatprep.subr.mxu0 %v1399_v51 }
  0x45   : > { %738 = vmatpush1.msra.mxu0 %v1699_v0 }
  0x46   : > { %739 = vmatprep.subr.mxu0 %v1399_v51 }
  0x47   : > { %740 = vmatpush1.msra.mxu0 %v1706_v1 }
  0x48   : > { %741 = vmatprep.subr.mxu0 %v1399_v51 }
  0x49   : > { %742 = vmatpush1.msra.mxu0 %v1713_v2 }
  0x4a   : > { %743 = vmatprep.subr.mxu0 %v1399_v51 }
  0x4b   : > { %744 = vmatpush1.msra.mxu0 %v1720_v3 }
  0x4c   : > { %745 = vmatprep.subr.mxu0 %v1399_v51 }
  0x4d   : > { %746 = vmatpush1.msra.mxu0 %v1727_v4 }
  0x4e   : > { %763 = vmatprep.subr.mxu0 %v1399_v51 }
  0x4f   : > { %764 = vmatpush2.msra.mxu0 %v1734_v5 }
  0x50   : > { %765 = vmatprep.subr.mxu0 %v1399_v51 }
  0x51   : > { %766 = vmatpush2.msra.mxu0 %v1741_v6 }
  0x52   : > { %767 = vmatprep.subr.mxu0 %v1399_v51 }
  0x53   : > { %768 = vmatpush2.msra.mxu0 %v1748_v7 }
  0x54   : > { %769 = vmatprep.subr.mxu0 %v1399_v51 }
  0x55   : > { %770 = vmatpush2.msra.mxu0 %v1755_v8 }
  0x56   : > { %771 = vmatprep.subr.mxu0 %v1399_v51 }
  0xdc   : > { %v1190_v9 = vpop.f32.mrf.mxu0 }
  0xdd   : > { %v314_v14 = vadd.f32 %v1190_v9, %v1764_v10 }
  0xde   : > { %v308_v11 = vpop.f32.mrf.mxu0 }
  0xdf   : > { %v309_v12 = vadd.f32 %v308_v11, %v1764_v10 }
  0xe0   : > { %v1193_v13 = vpop.f32.mrf.mxu0 }
  0xe1   : > { %1305 = vtanh.f32 %v309_v12  ;;  %v324_v18 = vadd.f32 %v1193_v13, %v1764_v10 }
  0xe2   : > { %v318_v15 = vpop.f32.mrf.mxu0  ;;  %1307 = vtanh.f32 %v314_v14 }
  0xe3   : > { %v319_v16 = vadd.f32 %v318_v15, %v1764_v10 }
  0xe4   : > { %v1196_v17 = vpop.f32.mrf.mxu0 }
  0xe5   : > { %1309 = vtanh.f32 %v319_v16  ;;  %v334_v23 = vadd.f32 %v1196_v17, %v1764_v10 }
  0xe6   : > { %v328_v19 = vpop.f32.mrf.mxu0  ;;  %1311 = vtanh.f32 %v324_v18 }
  0xe7   : > { %v329_v20 = vadd.f32 %v328_v19, %v1764_v10 }
  0xe8   : > { %v1199_v22 = vpop.f32.mrf.mxu0 }
  0xe9   : > { %1313 = vtanh.f32 %v329_v20  ;;  %v344_v29 = vadd.f32 %v1199_v22, %v1764_v10 }
  0xea   : > { %v338_v25 = vpop.f32.mrf.mxu0  ;;  %1315 = vtanh.f32 %v334_v23 }
  0xeb   : > { %v339_v26 = vadd.f32 %v338_v25, %v1764_v10 }
  0xec   : > { %v1202_v28 = vpop.f32.mrf.mxu0 }
  0xed   : > { %1317 = vtanh.f32 %v339_v26  ;;  %v354_v35 = vadd.f32 %v1202_v28, %v1764_v10 }
  0xee   : > { %v1306_v21 = vpop.eup %1305  ;;  %v348_v31 = vpop.f32.mrf.mxu0  ;;  %1319 = vtanh.f32 %v344_v29 }
  0xef   : > { %513 = vmatmul.mubr.f32.vlgmr.msra.gmra.mxu1 %v1306_v21  ;;  %v1308_v24 = vpop.eup %1307  ;;  %v349_v32 = vadd.f32 %v348_v31, %v1764_v10 }
  0xf0   : > { %518 = vmatprep.mubr.f32.mxu1 %v1399_v51  ;;  %1236 = vmatpush1.msra.mxu1 %v1624_v53  ;;  %v1205_v34 = vpop.f32.mrf.mxu0 }
  0xf1   : > { %1213 = vmatprep.subr.mxu1 %v1399_v51  ;;  %1321 = vtanh.f32 %v349_v32  ;;  %v364_v41 = vadd.f32 %v1205_v34, %v1764_v10 }
  0xf2   : > { %1237 = vmatpush1.msra.mxu1 %v1629_v54  ;;  %v1310_v27 = vpop.eup %1309  ;;  %v358_v37 = vpop.f32.mrf.mxu0  ;;  %1323 = vtanh.f32 %v354_v35 }
  0xf3   : > { %519 = vmatmul.mubr.f32.gmra.mxu1 %v1308_v24  ;;  %1214 = vmatprep.subr.mxu1 %v1399_v51  ;;  %v1312_v30 = vpop.eup %1311  ;;  %v359_v38 = vadd.f32 %v358_v37, %v1764_v10 }
  0xf4   : > { %524 = vmatprep.mubr.f32.mxu1 %v1399_v51  ;;  %1238 = vmatpush1.msra.mxu1 %v1636_v55  ;;  %v1208_v40 = vpop.f32.mrf.mxu0 }
  0xf5   : > { %1215 = vmatprep.subr.mxu1 %v1399_v51  ;;  %1325 = vtanh.f32 %v359_v38  ;;  %v374_v47 = vadd.f32 %v1208_v40, %v1764_v10 }
  0xf6   : > { %1239 = vmatpush1.msra.mxu1 %v1643_v56  ;;  %v1314_v33 = vpop.eup %1313  ;;  %v368_v43 = vpop.f32.mrf.mxu0  ;;  %1327 = vtanh.f32 %v364_v41 }
  0xf7   : > { %525 = vmatmul.mubr.f32.gmra.mxu1 %v1310_v27  ;;  %1216 = vmatprep.subr.mxu1 %v1399_v51  ;;  %v1316_v36 = vpop.eup %1315  ;;  %v369_v44 = vadd.f32 %v368_v43, %v1764_v10 }
  0xf8   : > { %530 = vmatprep.mubr.f32.mxu1 %v1399_v51  ;;  %1240 = vmatpush1.msra.mxu1 %v1650_v57  ;;  %v1211_v46 = vpop.f32.mrf.mxu0 }
  0xf9   : > { %1217 = vmatprep.subr.mxu1 %v1399_v51  ;;  %1329 = vtanh.f32 %v369_v44  ;;  %v384_v53 = vadd.f32 %v1211_v46, %v1764_v10 }
  0xfa   : > { %1241 = vmatpush1.msra.mxu1 %v1657_v58  ;;  %v1318_v39 = vpop.eup %1317  ;;  %v378_v49 = vpop.f32.mrf.mxu0  ;;  %1331 = vtanh.f32 %v374_v47 }
  0xfb   : > { %531 = vmatmul.mubr.f32.gmra.mxu1 %v1312_v30  ;;  %1218 = vmatprep.subr.mxu1 %v1399_v51  ;;  %v1320_v42 = vpop.eup %1319  ;;  %v379_v50 = vadd.f32 %v378_v49, %v1764_v10 }
  0xfc   : > { %536 = vmatprep.mubr.f32.mxu1 %v1399_v51  ;;  %1242 = vmatpush1.msra.mxu1 %v1664_v59  ;;  %v660_v59 = vld [vmem:[%s2028_s1 + $0x270] sm:$0xff] }
  0xfd   : > { %1219 = vmatprep.subr.mxu1 %v1399_v51  ;;  %1333 = vtanh.f32 %v379_v50  ;;  %772 = vmatpush2.msra.mxu0 %v660_v59 }
  0xfe   : > { %1243 = vmatpush1.msra.mxu1 %v1671_v60  ;;  %v1322_v45 = vpop.eup %1321  ;;  %1335 = vtanh.f32 %v384_v53  ;;  %773 = vmatprep.subr.mxu0 %v1399_v51  ;;  %v659_v60 = vld [vmem:[%s2028_s1 + $0x260] sm:$0xff] }
  0xff   : > { %537 = vmatmul.mubr.f32.gmra.mxu1 %v1314_v33  ;;  %1220 = vmatprep.subr.mxu1 %v1399_v51  ;;  %v1324_v48 = vpop.eup %1323 }
 0x100   : > { %542 = vmatprep.mubr.f32.mxu1 %v1399_v51  ;;  %1244 = vmatpush1.msra.mxu1 %v1678_v61  ;;  %v658_v61 = vld [vmem:[%s2028_s1 + $0x250] sm:$0xff] }
 0x101   : > { %1221 = vmatprep.subr.mxu1 %v1399_v51  ;;  %774 = vmatpush2.msra.mxu0 %v659_v60 }
 0x102   : > { %1245 = vmatpush1.msra.mxu1 %v1685_v62  ;;  %v1326_v52 = vpop.eup %1325  ;;  %775 = vmatprep.subr.mxu0 %v1399_v51  ;;  %v657_v62 = vld [vmem:[%s2028_s1 + $0x240] sm:$0xff] }
 0x103   : > { %543 = vmatmul.mubr.f32.gmra.mxu1 %v1316_v36  ;;  %1222 = vmatprep.subr.mxu1 %v1399_v51  ;;  %v1328_v54 = vpop.eup %1327 }
 0x104   : > { %548 = vmatprep.mubr.f32.mxu1 %v1399_v51  ;;  %1246 = vmatpush1.msra.mxu1 %v1692_v63  ;;  %v438_v63 = vlaneseq }
 0x105   : > { %1223 = vmatprep.subr.mxu1 %v1399_v51  ;;  %776 = vmatpush2.msra.mxu0 %v658_v61 }
 0x106   : > { %1247 = vmatpush1.msra.mxu1 %v1699_v0  ;;  %v1330_v55 = vpop.eup %1329  ;;  %777 = vmatprep.subr.mxu0 %v1399_v51  ;;  %v439_v0 = vshrl.u32 %v438_v63, 7 }
 0x107   : > { %549 = vmatmul.mubr.f32.gmra.mxu1 %v1318_v39  ;;  %1224 = vmatprep.subr.mxu1 %v1399_v51  ;;  %v1332_v56 = vpop.eup %1331 }
 0x108   : > { %554 = vmatprep.mubr.f32.mxu1 %v1399_v51  ;;  %1248 = vmatpush1.msra.mxu1 %v1706_v1  ;;  %v440_v1 = vsub.s32 0, %v439_v0 }
 0x109   : > { %1225 = vmatprep.subr.mxu1 %v1399_v51  ;;  %778 = vmatpush2.msra.mxu0 %v657_v62 }
 0x10a   : > { %1249 = vmatpush1.msra.mxu1 %v1713_v2  ;;  %v1334_v57 = vpop.eup %1333  ;;  %v1137_v2 = vld [vmem:[%s2029_s2 + $0x1] ss:$8 sm:$0x3] }
 0x10b   : > { %555 = vmatmul.mubr.f32.gmra.mxu1 %v1320_v42  ;;  %1226 = vmatprep.subr.mxu1 %v1399_v51  ;;  %v1336_v58 = vpop.eup %1335 }
 0x10c   : > { %560 = vmatprep.mubr.f32.mxu1 %v1399_v51  ;;  %1250 = vmatpush1.msra.mxu1 %v1720_v3  ;;  %v444_v3 = vsub.s32 1, %v439_v0 }
 0x10d   : > { %1227 = vmatprep.subr.mxu1 %v1399_v51 }
 0x10e   : > { %1251 = vmatpush1.msra.mxu1 %v1727_v4  ;;  %v1858_v4 = vrot.slane %v1137_v2, %v440_v1 }
 0x10f   : > { %561 = vmatmul.mubr.f32.gmra.mxu1 %v1322_v45  ;;  %1228 = vmatprep.subr.mxu1 %v1399_v51 }
 0x110   : > { %566 = vmatprep.mubr.f32.mxu1 %v1399_v51  ;;  %1252 = vmatpush2.msra.mxu1 %v1734_v5  ;;  %v1860_v5 = vrot.slane %v1137_v2, %v444_v3 }
 0x111   : > { %1229 = vmatprep.subr.mxu1 %v1399_v51 }
 0x112   : > { %1253 = vmatpush2.msra.mxu1 %v1741_v6 }
 0x113   : > { %567 = vmatmul.mubr.f32.gmra.mxu1 %v1324_v48  ;;  %1230 = vmatprep.subr.mxu1 %v1399_v51 }
 0x114   : > { %572 = vmatprep.mubr.f32.mxu1 %v1399_v51  ;;  %1254 = vmatpush2.msra.mxu1 %v1748_v7 }
 0x115   : > { %1231 = vmatprep.subr.mxu1 %v1399_v51 }
 0x116   : > { %1255 = vmatpush2.msra.mxu1 %v1755_v8 }
 0x117   : > { %573 = vmatmul.mubr.f32.gmra.mxu1 %v1326_v52  ;;  %1232 = vmatprep.subr.mxu1 %v1399_v51 }
 0x118   : > { %578 = vmatprep.mubr.f32.mxu1 %v1399_v51  ;;  %1256 = vmatpush2.msra.mxu1 %v660_v59 }
 0x119   : > { %1233 = vmatprep.subr.mxu1 %v1399_v51 }
 0x11a   : > { %1257 = vmatpush2.msra.mxu1 %v659_v60 }
 0x11b   : > { %579 = vmatmul.mubr.f32.gmra.mxu1 %v1328_v54  ;;  %1234 = vmatprep.subr.mxu1 %v1399_v51 }
 0x11c   : > { %584 = vmatprep.mubr.f32.mxu1 %v1399_v51  ;;  %1258 = vmatpush2.msra.mxu1 %v658_v61 }
 0x11d   : > { %1235 = vmatprep.subr.mxu1 %v1399_v51 }
 0x11e   : > { %1259 = vmatpush2.msra.mxu1 %v657_v62 }
 0x11f   : > { %585 = vmatmul.mubr.f32.gmra.mxu1 %v1330_v55 }
 0x120   : > { %590 = vmatprep.mubr.f32.mxu1 %v1399_v51 }
 0x123   : > { %591 = vmatmul.mubr.f32.gmra.mxu1 %v1332_v56 }
 0x124   : > { %596 = vmatprep.mubr.f32.mxu1 %v1399_v51 }
 0x127   : > { %597 = vmatmul.mubr.f32.gmra.mxu1 %v1334_v57 }
 0x128   : > { %602 = vmatprep.mubr.f32.mxu1 %v1399_v51 }
 0x12b   : > { %603 = vmatmul.mubr.f32.gmra.mxu1 %v1336_v58 }
 0x1af   : > { %v514_v6 = vpop.f32.mrf.mxu1 }
 0x1b0   : > { %v515_v7 = vadd.f32 %v514_v6, %v1858_v4 }
 0x1b1   : > { %v516_v8 = vpop.f32.mrf.mxu1 }
 0x1b2   : > { %v517_v51 = vadd.f32 %v516_v8, %v1860_v5  ;;  %v609_v11 = vmax.f32 %v515_v7, 0.0 }
 0x1b3   : > { %v520_v9 = vpop.f32.mrf.mxu1 }
 0x1b4   : > { %v610_v10 = vmax.f32 %v517_v51, 0.0  ;;  %v521_v12 = vadd.f32 %v520_v9, %v1858_v4 }
 0x1b5   : > { %v522_v13 = vpop.f32.mrf.mxu1 }
 0x1b6   : > { %v523_v14 = vadd.f32 %v522_v13, %v1860_v5  ;;  %1138 = vmatprep.mubr.msk.f32.mxu0 %vm666_vm1, %v610_v10  ;;  %v611_v17 = vmax.f32 %v521_v12, 0.0 }
 0x1b7   : > { %v526_v15 = vpop.f32.mrf.mxu1  ;;  %780 = vmatmul.mubr.f32.vlgmr.msra.gmra.mxu0 %v609_v11 }
 0x1b8   : > { %v612_v16 = vmax.f32 %v523_v14, 0.0  ;;  %v527_v18 = vadd.f32 %v526_v15, %v1858_v4 }
 0x1b9   : > { %v528_v19 = vpop.f32.mrf.mxu1 }
 0x1ba   : > { %v529_v20 = vadd.f32 %v528_v19, %v1860_v5  ;;  %1139 = vmatprep.mubr.msk.f32.mxu0 %vm666_vm1, %v612_v16  ;;  %v613_v23 = vmax.f32 %v527_v18, 0.0 }
 0x1bb   : > { %v532_v21 = vpop.f32.mrf.mxu1  ;;  %785 = vmatmul.mubr.f32.gmra.mxu0 %v611_v17 }
 0x1bc   : > { %v614_v22 = vmax.f32 %v529_v20, 0.0  ;;  %v533_v24 = vadd.f32 %v532_v21, %v1858_v4 }
 0x1bd   : > { %v534_v25 = vpop.f32.mrf.mxu1 }
 0x1be   : > { %v535_v26 = vadd.f32 %v534_v25, %v1860_v5  ;;  %1140 = vmatprep.mubr.msk.f32.mxu0 %vm666_vm1, %v614_v22  ;;  %v615_v29 = vmax.f32 %v533_v24, 0.0 }
 0x1bf   : > { %v538_v27 = vpop.f32.mrf.mxu1  ;;  %790 = vmatmul.mubr.f32.gmra.mxu0 %v613_v23 }
 0x1c0   : > { %v616_v28 = vmax.f32 %v535_v26, 0.0  ;;  %v539_v30 = vadd.f32 %v538_v27, %v1858_v4 }
 0x1c1   : > { %v540_v31 = vpop.f32.mrf.mxu1 }
 0x1c2   : > { %v541_v32 = vadd.f32 %v540_v31, %v1860_v5  ;;  %1141 = vmatprep.mubr.msk.f32.mxu0 %vm666_vm1, %v616_v28  ;;  %v617_v35 = vmax.f32 %v539_v30, 0.0 }
 0x1c3   : > { %v544_v33 = vpop.f32.mrf.mxu1  ;;  %795 = vmatmul.mubr.f32.gmra.mxu0 %v615_v29 }
 0x1c4   : > { %v618_v34 = vmax.f32 %v541_v32, 0.0  ;;  %v545_v36 = vadd.f32 %v544_v33, %v1858_v4 }
 0x1c5   : > { %v546_v37 = vpop.f32.mrf.mxu1 }
 0x1c6   : > { %v547_v38 = vadd.f32 %v546_v37, %v1860_v5  ;;  %1142 = vmatprep.mubr.msk.f32.mxu0 %vm666_vm1, %v618_v34  ;;  %v619_v41 = vmax.f32 %v545_v36, 0.0 }
 0x1c7   : > { %v550_v39 = vpop.f32.mrf.mxu1  ;;  %800 = vmatmul.mubr.f32.gmra.mxu0 %v617_v35 }
 0x1c8   : > { %v620_v40 = vmax.f32 %v547_v38, 0.0  ;;  %v551_v42 = vadd.f32 %v550_v39, %v1858_v4  ;;  %v1913_v39 = vld [vmem:[%s2029_s2 + $0x2] ss:$0 sm:$0xff] }
 0x1c9   : > { %v552_v43 = vpop.f32.mrf.mxu1 }
 0x1ca   : > { %v553_v44 = vadd.f32 %v552_v43, %v1860_v5  ;;  %1143 = vmatprep.mubr.msk.f32.mxu0 %vm666_vm1, %v620_v40  ;;  %v621_v47 = vmax.f32 %v551_v42, 0.0 }
 0x1cb   : > { %v556_v45 = vpop.f32.mrf.mxu1  ;;  %805 = vmatmul.mubr.f32.gmra.mxu0 %v619_v41 }
 0x1cc   : > { %v622_v46 = vmax.f32 %v553_v44, 0.0  ;;  %v557_v48 = vadd.f32 %v556_v45, %v1858_v4 }
 0x1cd   : > { %v558_v49 = vpop.f32.mrf.mxu1 }
 0x1ce   : > { %v559_v50 = vadd.f32 %v558_v49, %v1860_v5  ;;  %1144 = vmatprep.mubr.msk.f32.mxu0 %vm666_vm1, %v622_v46  ;;  %v623_v54 = vmax.f32 %v557_v48, 0.0 }
 0x1cf   : > { %v562_v52 = vpop.f32.mrf.mxu1  ;;  %810 = vmatmul.mubr.f32.gmra.mxu0 %v621_v47 }
 0x1d0   : > { %v624_v53 = vmax.f32 %v559_v50, 0.0  ;;  %v563_v55 = vadd.f32 %v562_v52, %v1858_v4 }
 0x1d1   : > { %v564_v56 = vpop.f32.mrf.mxu1 }
 0x1d2   : > { %v565_v57 = vadd.f32 %v564_v56, %v1860_v5  ;;  %1145 = vmatprep.mubr.msk.f32.mxu0 %vm666_vm1, %v624_v53  ;;  %v625_v60 = vmax.f32 %v563_v55, 0.0 }
 0x1d3   : > { %v568_v58 = vpop.f32.mrf.mxu1  ;;  %815 = vmatmul.mubr.f32.gmra.mxu0 %v623_v54 }
 0x1d4   : > { %v626_v59 = vmax.f32 %v565_v57, 0.0  ;;  %v569_v61 = vadd.f32 %v568_v58, %v1858_v4 }
 0x1d5   : > { %v570_v62 = vpop.f32.mrf.mxu1 }
 0x1d6   : > { %v571_v63 = vadd.f32 %v570_v62, %v1860_v5  ;;  %1146 = vmatprep.mubr.msk.f32.mxu0 %vm666_vm1, %v626_v59  ;;  %v627_v2 = vmax.f32 %v569_v61, 0.0 }
 0x1d7   : > { %v574_v0 = vpop.f32.mrf.mxu1  ;;  %820 = vmatmul.mubr.f32.gmra.mxu0 %v625_v60 }
 0x1d8   : > { %v628_v1 = vmax.f32 %v571_v63, 0.0  ;;  %v575_v3 = vadd.f32 %v574_v0, %v1858_v4  ;;  %v1400_v63 = vmov 0  }
 0x1d9   : > { %v576_v6 = vpop.f32.mrf.mxu1  ;;  %1303 = vset.pattern.permute.xlu0 %v1400_v63  ;;  %1304 = vset.pattern.permute.xlu1 %v1400_v63 }
 0x1da   : > { %v577_v7 = vadd.f32 %v576_v6, %v1860_v5  ;;  %1147 = vmatprep.mubr.msk.f32.mxu0 %vm666_vm1, %v628_v1  ;;  %v629_v9 = vmax.f32 %v575_v3, 0.0 }
 0x1db   : > { %v580_v8 = vpop.f32.mrf.mxu1  ;;  %825 = vmatmul.mubr.f32.gmra.mxu0 %v627_v2 }
 0x1dc   : > { %v630_v51 = vmax.f32 %v577_v7, 0.0  ;;  %v581_v10 = vadd.f32 %v580_v8, %v1858_v4 }
 0x1dd   : > { %v582_v11 = vpop.f32.mrf.mxu1 }
 0x1de   : > { %v583_v12 = vadd.f32 %v582_v11, %v1860_v5  ;;  %1148 = vmatprep.mubr.msk.f32.mxu0 %vm666_vm1, %v630_v51  ;;  %v631_v15 = vmax.f32 %v581_v10, 0.0 }
 0x1df   : > { %v586_v13 = vpop.f32.mrf.mxu1  ;;  %830 = vmatmul.mubr.f32.gmra.mxu0 %v629_v9 }
 0x1e0   : > { %v632_v14 = vmax.f32 %v583_v12, 0.0  ;;  %v587_v16 = vadd.f32 %v586_v13, %v1858_v4 }
 0x1e1   : > { %v588_v17 = vpop.f32.mrf.mxu1 }
 0x1e2   : > { %v589_v18 = vadd.f32 %v588_v17, %v1860_v5  ;;  %1149 = vmatprep.mubr.msk.f32.mxu0 %vm666_vm1, %v632_v14  ;;  %v633_v21 = vmax.f32 %v587_v16, 0.0 }
 0x1e3   : > { %v592_v19 = vpop.f32.mrf.mxu1  ;;  %835 = vmatmul.mubr.f32.gmra.mxu0 %v631_v15 }
 0x1e4   : > { %v634_v20 = vmax.f32 %v589_v18, 0.0  ;;  %v593_v22 = vadd.f32 %v592_v19, %v1858_v4 }
 0x1e5   : > { %v594_v23 = vpop.f32.mrf.mxu1 }
 0x1e6   : > { %v595_v24 = vadd.f32 %v594_v23, %v1860_v5  ;;  %1150 = vmatprep.mubr.msk.f32.mxu0 %vm666_vm1, %v634_v20  ;;  %v635_v27 = vmax.f32 %v593_v22, 0.0 }
 0x1e7   : > { %v598_v25 = vpop.f32.mrf.mxu1  ;;  %840 = vmatmul.mubr.f32.gmra.mxu0 %v633_v21 }
 0x1e8   : > { %v636_v26 = vmax.f32 %v595_v24, 0.0  ;;  %v599_v28 = vadd.f32 %v598_v25, %v1858_v4 }
 0x1e9   : > { %v600_v29 = vpop.f32.mrf.mxu1 }
 0x1ea   : > { %v601_v30 = vadd.f32 %v600_v29, %v1860_v5  ;;  %1151 = vmatprep.mubr.msk.f32.mxu1 %vm666_vm1, %v636_v26  ;;  %v637_v33 = vmax.f32 %v599_v28, 0.0 }
 0x1eb   : > { %v604_v31 = vpop.f32.mrf.mxu1  ;;  %845 = vmatmul.mubr.f32.vlgmr.msra.gmra.mxu1 %v635_v27 }
 0x1ec   : > { %v638_v32 = vmax.f32 %v601_v30, 0.0  ;;  %v605_v34 = vadd.f32 %v604_v31, %v1858_v4 }
 0x1ed   : > { %v606_v35 = vpop.f32.mrf.mxu1 }
 0x1ee   : > { %v607_v36 = vadd.f32 %v606_v35, %v1860_v5  ;;  %1152 = vmatprep.mubr.msk.f32.mxu1 %vm666_vm1, %v638_v32  ;;  %v639_v38 = vmax.f32 %v605_v34, 0.0  ;;  %v1919_v5 = vld [vmem:[%s2028_s1 + $0x2c0] ss:$0 sm:$0xff] }
 0x1ef   : > { %850 = vmatmul.mubr.f32.gmra.mxu1 %v637_v33 }
 0x1f0   : > { %v640_v37 = vmax.f32 %v607_v36, 0.0 }
 0x1f2   : > { %1153 = vmatprep.mubr.msk.f32.mxu1 %vm666_vm1, %v640_v37 }
 0x1f3   : > { %855 = vmatmul.mubr.f32.gmra.mxu1 %v639_v38 }
 0x277   : > { %v781_v40 = vpop.f32.mrf.mxu0 }
 0x278   : > { %v782_v41 = vadd.f32 %v781_v40, %v1913_v39 }
 0x279   : > { %v783_v4 = vpop.f32.mrf.mxu0 }
 0x27a   : > { %v860_v42 = vmax.f32 %v782_v41, 0.0 }
 0x27b   : > { %v786_v43 = vpop.f32.mrf.mxu0 }
 0x27c   : > { %v787_v44 = vadd.f32 %v786_v43, %v1913_v39  ;;  %v878_v45 = vmul.f32 %v1919_v5, %v860_v42 }
 0x27d   : > { %v788_v46 = vpop.f32.mrf.mxu0 }
 0x27e   : > { %v861_v47 = vmax.f32 %v787_v44, 0.0  ;;  %894 = vadd.xlane.f32.xlu0 %v878_v45 }
 0x27f   : > { %v791_v48 = vpop.f32.mrf.mxu0 }
 0x280   : > { %v792_v49 = vadd.f32 %v791_v48, %v1913_v39  ;;  %v879_v50 = vmul.f32 %v1919_v5, %v861_v47 }
 0x281   : > { %v793_v52 = vpop.f32.mrf.mxu0 }
 0x282   : > { %v862_v53 = vmax.f32 %v792_v49, 0.0  ;;  %896 = vadd.xlane.f32.xlu0 %v879_v50 }
 0x283   : > { %v796_v54 = vpop.f32.mrf.mxu0 }
 0x284   : > { %v797_v55 = vadd.f32 %v796_v54, %v1913_v39  ;;  %v880_v56 = vmul.f32 %v1919_v5, %v862_v53 }
 0x285   : > { %v798_v57 = vpop.f32.mrf.mxu0 }
 0x286   : > { %v863_v58 = vmax.f32 %v797_v55, 0.0  ;;  %898 = vadd.xlane.f32.xlu1 %v880_v56 }
 0x287   : > { %v801_v59 = vpop.f32.mrf.mxu0 }
 0x288   : > { %v802_v60 = vadd.f32 %v801_v59, %v1913_v39  ;;  %v881_v61 = vmul.f32 %v1919_v5, %v863_v58  ;;  %v877_v59 = vld [vmem:[%s2029_s2 + $0x3] ss:$0 sm:$0xff] }
 0x289   : > { %v803_v62 = vpop.f32.mrf.mxu0 }
 0x28a   : > { %v864_v0 = vmax.f32 %v802_v60, 0.0  ;;  %900 = vadd.xlane.f32.xlu1 %v881_v61 }
 0x28b   : > { %v806_v1 = vpop.f32.mrf.mxu0 }
 0x28c   : > { %v807_v2 = vadd.f32 %v806_v1, %v1913_v39  ;;  %v882_v3 = vmul.f32 %v1919_v5, %v864_v0 }
 0x28d   : > { %v808_v6 = vpop.f32.mrf.mxu0 }
 0x28e   : > { %v865_v7 = vmax.f32 %v807_v2, 0.0  ;;  %902 = vadd.xlane.f32.xlu0 %v882_v3 }
 0x28f   : > { %v811_v8 = vpop.f32.mrf.mxu0 }
 0x290   : > { %v812_v51 = vadd.f32 %v811_v8, %v1913_v39  ;;  %v883_v9 = vmul.f32 %v1919_v5, %v865_v7 }
 0x291   : > { %v813_v10 = vpop.f32.mrf.mxu0 }
 0x292   : > { %v866_v11 = vmax.f32 %v812_v51, 0.0  ;;  %904 = vadd.xlane.f32.xlu1 %v883_v9 }
 0x293   : > { %v816_v12 = vpop.f32.mrf.mxu0 }
 0x294   : > { %v817_v13 = vadd.f32 %v816_v12, %v1913_v39  ;;  %v884_v14 = vmul.f32 %v1919_v5, %v866_v11 }
 0x295   : > { %v818_v15 = vpop.f32.mrf.mxu0 }
 0x296   : > { %v867_v16 = vmax.f32 %v817_v13, 0.0  ;;  %906 = vadd.xlane.f32.xlu0 %v884_v14 }
 0x297   : > { %v821_v17 = vpop.f32.mrf.mxu0 }
 0x298   : > { %v822_v18 = vadd.f32 %v821_v17, %v1913_v39  ;;  %v885_v19 = vmul.f32 %v1919_v5, %v867_v16 }
 0x299   : > { %v823_v20 = vpop.f32.mrf.mxu0 }
 0x29a   : > { %v868_v21 = vmax.f32 %v822_v18, 0.0  ;;  %908 = vadd.xlane.f32.xlu1 %v885_v19 }
 0x29b   : > { %v826_v22 = vpop.f32.mrf.mxu0 }
 0x29c   : > { %v827_v23 = vadd.f32 %v826_v22, %v1913_v39  ;;  %v886_v24 = vmul.f32 %v1919_v5, %v868_v21 }
 0x29d   : > { %v828_v25 = vpop.f32.mrf.mxu0 }
 0x29e   : > { %v869_v26 = vmax.f32 %v827_v23, 0.0  ;;  %910 = vadd.xlane.f32.xlu0 %v886_v24 }
 0x29f   : > { %v831_v27 = vpop.f32.mrf.mxu0 }
 0x2a0   : > { %v832_v28 = vadd.f32 %v831_v27, %v1913_v39  ;;  %v887_v29 = vmul.f32 %v1919_v5, %v869_v26 }
 0x2a1   : > { %v833_v30 = vpop.f32.mrf.mxu0 }
 0x2a2   : > { %v870_v31 = vmax.f32 %v832_v28, 0.0  ;;  %912 = vadd.xlane.f32.xlu1 %v887_v29 }
 0x2a3   : > { %v836_v32 = vpop.f32.mrf.mxu0 }
 0x2a4   : > { %v837_v33 = vadd.f32 %v836_v32, %v1913_v39  ;;  %v888_v34 = vmul.f32 %v1919_v5, %v870_v31 }
 0x2a5   : > { %v838_v35 = vpop.f32.mrf.mxu0 }
 0x2a6   : > { %v871_v36 = vmax.f32 %v837_v33, 0.0  ;;  %914 = vadd.xlane.f32.xlu0 %v888_v34 }
 0x2a7   : > { %v841_v37 = vpop.f32.mrf.mxu0 }
 0x2a8   : > { %v842_v38 = vadd.f32 %v841_v37, %v1913_v39  ;;  %v889_v40 = vmul.f32 %v1919_v5, %v871_v36 }
 0x2a9   : > { %v843_v41 = vpop.f32.mrf.mxu0 }
 0x2aa   : > { %v872_v4 = vmax.f32 %v842_v38, 0.0  ;;  %916 = vadd.xlane.f32.xlu1 %v889_v40 }
 0x2ab   : > { %v846_v42 = vpop.f32.mrf.mxu1 }
 0x2ac   : > { %v847_v43 = vadd.f32 %v846_v42, %v1913_v39  ;;  %v890_v44 = vmul.f32 %v1919_v5, %v872_v4 }
 0x2ad   : > { %v848_v45 = vpop.f32.mrf.mxu1 }
 0x2ae   : > { %v873_v46 = vmax.f32 %v847_v43, 0.0  ;;  %918 = vadd.xlane.f32.xlu0 %v890_v44 }
 0x2af   : > { %v851_v47 = vpop.f32.mrf.mxu1 }
 0x2b0   : > { %v852_v48 = vadd.f32 %v851_v47, %v1913_v39  ;;  %v891_v49 = vmul.f32 %v1919_v5, %v873_v46 }
 0x2b1   : > { %v853_v50 = vpop.f32.mrf.mxu1 }
 0x2b2   : > { %v874_v52 = vmax.f32 %v852_v48, 0.0  ;;  %920 = vadd.xlane.f32.xlu1 %v891_v49 }
 0x2b3   : > { %v856_v53 = vpop.f32.mrf.mxu1 }
 0x2b4   : > { %v857_v54 = vadd.f32 %v856_v53, %v1913_v39  ;;  %v892_v55 = vmul.f32 %v1919_v5, %v874_v52 }
 0x2b5   : > { %v858_v56 = vpop.f32.mrf.mxu1 }
 0x2b6   : > { %v875_v57 = vmax.f32 %v857_v54, 0.0  ;;  %922 = vadd.xlane.f32.xlu0 %v892_v55 }
 0x2b8   : > { %v893_v58 = vmul.f32 %v1919_v5, %v875_v57 }
 0x2ba   : > { %924 = vadd.xlane.f32.xlu1 %v893_v58 }
 0x307   : > { %v895_v60 = vpop.xlane.xlu0 %894 }
 0x308   : > { %v926_v61 = vadd.f32 %v895_v60, %v877_v59 }
 0x30a   : > { %944 = vperm.xlu0 %1303, %v926_v61  }
 0x30b   : > { %v897_v62 = vpop.xlane.xlu0 %896 }
 0x30c   : > { %v927_v63 = vadd.f32 %v897_v62, %v877_v59 }
 0x30e   : > { %949 = vperm.xlu1 %1304, %v927_v63  }
 0x30f   : > { %v899_v0 = vpop.xlane.xlu1 %898 }
 0x310   : > { %v928_v39 = vadd.f32 %v899_v0, %v877_v59 }
 0x312   : > { %954 = vperm.xlu1 %1304, %v928_v39  }
 0x313   : > { %v901_v1 = vpop.xlane.xlu1 %900 }
 0x314   : > { %v929_v2 = vadd.f32 %v901_v1, %v877_v59 }
 0x316   : > { %959 = vperm.xlu1 %1304, %v929_v2  }
 0x317   : > { %v903_v3 = vpop.xlane.xlu0 %902 }
 0x318   : > { %v930_v6 = vadd.f32 %v903_v3, %v877_v59 }
 0x31a   : > { %964 = vperm.xlu1 %1304, %v930_v6  }
 0x31b   : > { %v905_v5 = vpop.xlane.xlu1 %904 }
 0x31c   : > { %v931_v7 = vadd.f32 %v905_v5, %v877_v59 }
 0x31e   : > { %969 = vperm.xlu1 %1304, %v931_v7  }
 0x31f   : > { %v907_v8 = vpop.xlane.xlu0 %906 }
 0x320   : > { %v932_v51 = vadd.f32 %v907_v8, %v877_v59 }
 0x322   : > { %974 = vperm.xlu1 %1304, %v932_v51  }
 0x323   : > { %v909_v9 = vpop.xlane.xlu1 %908 }
 0x324   : > { %v933_v10 = vadd.f32 %v909_v9, %v877_v59 }
 0x326   : > { %979 = vperm.xlu1 %1304, %v933_v10  }
 0x327   : > { %v911_v11 = vpop.xlane.xlu0 %910 }
 0x328   : > { %v934_v12 = vadd.f32 %v911_v11, %v877_v59 }
 0x32a   : > { %984 = vperm.xlu1 %1304, %v934_v12  }
 0x32b   : > { %v913_v13 = vpop.xlane.xlu1 %912 }
 0x32c   : > { %v935_v14 = vadd.f32 %v913_v13, %v877_v59 }
 0x32e   : > { %989 = vperm.xlu0 %1303, %v935_v14  }
 0x32f   : > { %v915_v15 = vpop.xlane.xlu0 %914 }
 0x330   : > { %v936_v16 = vadd.f32 %v915_v15, %v877_v59 }
 0x332   : > { %994 = vperm.xlu1 %1304, %v936_v16  }
 0x333   : > { %v917_v17 = vpop.xlane.xlu1 %916 }
 0x334   : > { %v937_v18 = vadd.f32 %v917_v17, %v877_v59 }
 0x336   : > { %999 = vperm.xlu0 %1303, %v937_v18  }
 0x337   : > { %v919_v19 = vpop.xlane.xlu0 %918 }
 0x338   : > { %v938_v20 = vadd.f32 %v919_v19, %v877_v59 }
 0x33a   : > { %1004 = vperm.xlu1 %1304, %v938_v20  }
 0x33b   : > { %v921_v21 = vpop.xlane.xlu1 %920 }
 0x33c   : > { %v939_v22 = vadd.f32 %v921_v21, %v877_v59 }
 0x33e   : > { %1009 = vperm.xlu0 %1303, %v939_v22  }
 0x33f   : > { %v923_v23 = vpop.xlane.xlu0 %922 }
 0x340   : > { %v940_v24 = vadd.f32 %v923_v23, %v877_v59 }
 0x342   : > { %1014 = vperm.xlu1 %1304, %v940_v24  }
 0x343   : > { %v925_v25 = vpop.xlane.xlu1 %924 }
 0x344   : > { %v941_v26 = vadd.f32 %v925_v25, %v877_v59 }
 0x346   : > { %1019 = vperm.xlu0 %1303, %v941_v26  }
 0x385   : > { %v945_v27 = vpop.permute.xlu0 %944 }
 0x386   : > { %1022 = vst [vmem:[%s1958_s4] sm:$0xff] %v945_v27 }
 0x389   : > { %v950_v28 = vpop.permute.xlu1 %949 }
 0x38a   : > { %1023 = vst [vmem:[%s1958_s4 + $0x8] sm:$0xff] %v950_v28 }
 0x38d   : > { %v955_v29 = vpop.permute.xlu1 %954 }
 0x38e   : > { %1024 = vst [vmem:[%s1958_s4 + $0x10] sm:$0xff] %v955_v29 }
 0x391   : > { %v960_v30 = vpop.permute.xlu1 %959 }
 0x392   : > { %1025 = vst [vmem:[%s1958_s4 + $0x18] sm:$0xff] %v960_v30 }
 0x395   : > { %v965_v31 = vpop.permute.xlu1 %964 }
 0x396   : > { %1026 = vst [vmem:[%s1958_s4 + $0x20] sm:$0xff] %v965_v31 }
 0x399   : > { %v970_v32 = vpop.permute.xlu1 %969 }
 0x39a   : > { %1027 = vst [vmem:[%s1958_s4 + $0x28] sm:$0xff] %v970_v32 }
 0x39d   : > { %v975_v33 = vpop.permute.xlu1 %974 }
 0x39e   : > { %1028 = vst [vmem:[%s1958_s4 + $0x30] sm:$0xff] %v975_v33 }
 0x3a1   : > { %v980_v34 = vpop.permute.xlu1 %979 }
 0x3a2   : > { %1029 = vst [vmem:[%s1958_s4 + $0x38] sm:$0xff] %v980_v34 }
 0x3a5   : > { %v985_v35 = vpop.permute.xlu1 %984 }
 0x3a6   : > { %1030 = vst [vmem:[%s1958_s4 + $0x40] sm:$0xff] %v985_v35 }
 0x3a9   : > { %v990_v36 = vpop.permute.xlu0 %989 }
 0x3aa   : > { %1031 = vst [vmem:[%s1958_s4 + $0x48] sm:$0xff] %v990_v36 }
 0x3ad   : > { %v995_v37 = vpop.permute.xlu1 %994 }
 0x3ae   : > { %1032 = vst [vmem:[%s1958_s4 + $0x50] sm:$0xff] %v995_v37 }
 0x3b1   : > { %v1000_v38 = vpop.permute.xlu0 %999 }
 0x3b2   : > { %1033 = vst [vmem:[%s1958_s4 + $0x58] sm:$0xff] %v1000_v38 }
 0x3b5   : > { %v1005_v40 = vpop.permute.xlu1 %1004 }
 0x3b6   : > { %1034 = vst [vmem:[%s1958_s4 + $0x60] sm:$0xff] %v1005_v40 }
 0x3b9   : > { %v1010_v41 = vpop.permute.xlu0 %1009 }
 0x3ba   : > { %1035 = vst [vmem:[%s1958_s4 + $0x68] sm:$0xff] %v1010_v41 }
 0x3bd   : > { %v1015_v4 = vpop.permute.xlu1 %1014 }
 0x3be   : > { %1036 = vst [vmem:[%s1958_s4 + $0x70] sm:$0xff] %v1015_v4 }
 0x3c1   : > { %v1020_v42 = vpop.permute.xlu0 %1019 }
 0x3c2   : > { %1037 = vst [vmem:[%s1958_s4 + $0x78] sm:$0xff] %v1020_v42 }
 0x3c3   : > { %1350 = shalt.err (!%p1347_p3)
}
 0x3c4   : > { %s1351_s27 = scalar_lea.hbm %s1980_s19, 2048  ;;  %s1355_s5 = scalar_lea.hbm %s2030_s3, 4096 }
 0x3c5   : > { %p1352_p4 = scmp.ne.s32.totalorder %s1980_s19, %s1351_s27  ;;  %p1356_p9 = scmp.lt.s32.totalorder %s1980_s19, %s2030_s3 }
 0x3c6   : > { %p1357_p10 = scmp.lt.s32.totalorder %s1355_s5, %s1351_s27 }
 0x3c7   : > { %p1353_p7 = pnand %p1352_p4, %p1462_p5 }
 0x3c8   : > { %p1358_p11 = por %p1357_p10, %p1356_p9 }
 0x3c9   : > { %p1354_p8 = pneg %p1353_p7 }
 0x3cb   : > { %p1359_p12 = pnand %p1358_p11, %p1354_p8 }
 0x3cd   : > { %1362 = shalt.err (!%p1359_p12)
}
 0x3ce   : > { %s1402_s8 = smov 128   ;;  %s1403_s28 = smov 8  }
 0x3cf   : > { %1260 = dma.vmem_to_hbm [thread:$0]  (%p1462_p5), %s1982_s10, 2048, %s1980_s19, %s1987_s20, %s1402_s8, %s1402_s8, %s1403_s28  }
 0x3d0 PF: > { %p1266_p13 = scmp.ge.s32.totalorder %s1397_s15, 2  ;;  %s1067_s4 = sand.u32 1, %s1385_s12  }
 0x3d1   : > { %s1068_s9 = scalar_lea.sflag [#allocation3], %s1067_s4 }
 0x3d2   : > { %p1263_p0 = pnand %p1266_p13, %p1466_p6 }
 0x3d4   : > { %p1264_p1 = pneg %p1263_p0 }
 0x3d6   : > { %1380 = dma.done.wait (%p1264_p1), %s1068_s9, 2048  }
 0x3d7   : > { %1382 = vsyncadd (%p1264_p1), %s1068_s9, 4294965248  ;;  %p13_p2 = scmp.ge.s32.totalorder %s1449_s18, 4   ;;  %s2033_s12 = smov %s1389_s13 }
 0x3d8   : > { %s2034_s13 = smov %s1393_s14  ;;  %s2035_s14 = smov %s1460_s21 }
 0x3d9   : > { %s2036_s15 = smov %s1449_s18  ;;  %15 = sbr.rel (!%p13_p2) target bundleno = 3 (0x3), region = 68 }
 0x3de   :  { %1073 = vsyncpa [#allocation3], 1 }
 0x3df   :  { %1075 = vsyncpa [#allocation3 + $0x1], 1 }

</bundles_post_ra>
